<compile_context>
chip_gen: v6e
topology: v6e:2x2x1
jax: 0.10.0
libtpu: 0.0.40
codegen_flags: <defaults>
</compile_context>

<pallas_src>
import jax
import jax.numpy as jnp
from jax.experimental import pallas as pl
from jax.experimental.pallas import tpu as pltpu

# Logical (PyTorch) dims.
K_DI = 28 * 28   # 784
K_D1 = 300
K_D2 = 200
K_DF = 10

# Lane-padded dims for the hidden feature axes (multiples of 128).
D1_PAD = 384
D2_PAD = 256
DF_PAD = 128     # weight/bias padding only; the kernel stores just K_DF columns

_TB_MAX = 1024   # max batch tile (rows)
_TB_SPLIT = 512  # above this batch size, force >= 2 grid steps (v7x dual-TC)


def _round_up(x, m):
    return (x + m - 1) // m * m


def _choose_batch_tile(batch):
    """Return (tb, padded_b).

    Prefers (a) a tile that divides the batch exactly (no jnp.pad pass over x),
    (b) tb a multiple of 8 (f32 sublane), (c) tb <= _TB_MAX, and (d) >= 2 grid
    steps for large batches so "parallel" can shard across v7x's 2 TensorCores.
    """
    batch = max(int(batch), 1)
    cap = _TB_MAX if batch <= _TB_SPLIT else min(_TB_MAX, batch // 2)
    cap = min(cap, batch)
    best = 0
    for tb in range(8, cap + 1, 8):
        if batch % tb == 0:
            best = tb
    if best == batch or best >= 128:
        return best, batch                       # exact fit -> no padding pass
    # Fall back: pad the batch up to a multiple of an aligned tile (small cases).
    aligned = _round_up(batch, 8)
    if aligned <= _TB_SPLIT:
        tb = min(aligned, _TB_MAX)
    else:
        n_tiles = max(2, -(-aligned // _TB_MAX))
        tb = _round_up(-(-aligned // n_tiles), 8)
    return tb, _round_up(batch, tb)


def _sigmoid_f32(z):
    # One EUP op (tanh) + cheap VPU mul/add; exact (no approx reciprocal).
    return 0.5 * jnp.tanh(0.5 * z) + 0.5


def _mlp_kernel(x_ref, w1_ref, b1_ref, w2_ref, b2_ref, w3_ref, b3_ref, o_ref):
    # x arrives in f32; cast to bf16 in-kernel (hidden under the layer-1 matmul).
    x = x_ref[...].astype(jnp.bfloat16)                               # (TB, 784)
    # Layer 1: Linear(784 -> 384pad) + Sigmoid   (bf16 MXU, f32 accumulate)
    z1 = jnp.dot(x, w1_ref[...], preferred_element_type=jnp.float32) + b1_ref[...]
    h1 = _sigmoid_f32(z1).astype(jnp.bfloat16)
    # Layer 2: Linear(384pad -> 256pad) + Sigmoid
    z2 = jnp.dot(h1, w2_ref[...], preferred_element_type=jnp.float32) + b2_ref[...]
    h2 = _sigmoid_f32(z2).astype(jnp.bfloat16)
    # Layer 3: Linear(256pad -> 128pad), no activation. Only the first K_DF
    # columns are real logits; store just those (tiny masked 10-lane store).
    z3 = jnp.dot(h2, w3_ref[...], preferred_element_type=jnp.float32) + b3_ref[...]
    o_ref[...] = z3[:, :K_DF].astype(o_ref.dtype)


def neural_network_forward(x_nchw, params):
    """Forward pass matching NeuralNetwork.forward: flatten + 3-layer MLP."""
    w1, b1, w2, b2, w3, b3 = params  # padded; weights bf16, biases f32
    batch = x_nchw.shape[0]

    # nn.Flatten(): (B, C, H, W) -> (B, C*H*W), row-major, same as torch.
    x_flat = x_nchw.reshape(batch, -1)
    assert x_flat.shape[1] == K_DI, f"expected {K_DI} features, got {x_flat.shape[1]}"

    tb, padded_b = _choose_batch_tile(batch)
    if padded_b != batch:  # only for small/irregular batches (cheap copy there)
        x_flat = jnp.pad(x_flat, ((0, padded_b - batch), (0, 0)))

    const = lambda i: (0, 0)  # weights/biases: same block every step (VMEM-resident)

    weight_bytes = (K_DI * D1_PAD + D1_PAD * D2_PAD + D2_PAD * DF_PAD) * 2 \
                   + (D1_PAD + D2_PAD + DF_PAD) * 4
    cost = pl.CostEstimate(
        flops=2 * batch * (K_DI * K_D1 + K_D1 * K_D2 + K_D2 * K_DF),
        transcendentals=batch * (K_D1 + K_D2),
        bytes_accessed=padded_b * K_DI * x_flat.dtype.itemsize
                       + weight_bytes + padded_b * K_DF * 4,
    )

    out = pl.pallas_call(
        _mlp_kernel,
        out_shape=jax.ShapeDtypeStruct((padded_b, K_DF), jnp.float32),
        grid=(padded_b // tb,),
        in_specs=[
            pl.BlockSpec((tb, K_DI), lambda i: (i, 0)),      # x: batch-tiled
            pl.BlockSpec((K_DI, D1_PAD), const),             # w1
            pl.BlockSpec((1, D1_PAD), const),                # b1
            pl.BlockSpec((D1_PAD, D2_PAD), const),           # w2
            pl.BlockSpec((1, D2_PAD), const),                # b2
            pl.BlockSpec((D2_PAD, DF_PAD), const),           # w3
            pl.BlockSpec((1, DF_PAD), const),                # b3
        ],
        out_specs=pl.BlockSpec((tb, K_DF), lambda i: (i, 0)),
        compiler_params=pltpu.CompilerParams(
            dimension_semantics=("parallel",),
            vmem_limit_bytes=32 * 1024 * 1024,
        ),
        cost_estimate=cost,
    )(x_flat, w1, b1, w2, b2, w3, b3)

    # No feature slice needed anymore; drop batch padding only if it was added.
    return out if padded_b == batch else out[:batch]


def init_params(key):
    """Deterministic init: weights ~ U(-1,1) (mirrors random_w_init), biases small.

    Weights are stored transposed vs torch ((in, out)) and zero-padded to the
    lane-aligned shapes; weights in bf16 (MXU dtype), biases in f32.
    Zero padding is numerically exact: padded hidden columns give sigmoid(0)=0.5
    but the corresponding rows of the next weight matrix are zero.
    """
    k1, k2, k3, kb1, kb2, kb3 = jax.random.split(key, 6)
    w1 = jax.random.uniform(k1, (K_DI, K_D1), jnp.float32, -1.0, 1.0)
    w2 = jax.random.uniform(k2, (K_D1, K_D2), jnp.float32, -1.0, 1.0)
    w3 = jax.random.uniform(k3, (K_D2, K_DF), jnp.float32, -1.0, 1.0)
    b1 = jax.random.uniform(kb1, (K_D1,), jnp.float32, -0.1, 0.1)
    b2 = jax.random.uniform(kb2, (K_D2,), jnp.float32, -0.1, 0.1)
    b3 = jax.random.uniform(kb3, (K_DF,), jnp.float32, -0.1, 0.1)

    w1p = jnp.pad(w1, ((0, 0), (0, D1_PAD - K_D1))).astype(jnp.bfloat16)
    w2p = jnp.pad(w2, ((0, D1_PAD - K_D1), (0, D2_PAD - K_D2))).astype(jnp.bfloat16)
    w3p = jnp.pad(w3, ((0, D2_PAD - K_D2), (0, DF_PAD - K_DF))).astype(jnp.bfloat16)
    b1p = jnp.pad(b1, (0, D1_PAD - K_D1)).reshape(1, D1_PAD).astype(jnp.float32)
    b2p = jnp.pad(b2, (0, D2_PAD - K_D2)).reshape(1, D2_PAD).astype(jnp.float32)
    b3p = jnp.pad(b3, (0, DF_PAD - K_DF)).reshape(1, DF_PAD).astype(jnp.float32)
    return (w1p, b1p, w2p, b2p, w3p, b3p)


def _reference_forward(x_nchw, params):
    """Plain-JAX reference with matching precision (bf16 matmuls, f32 activations)."""
    w1, b1, w2, b2, w3, b3 = params
    x = x_nchw.reshape(x_nchw.shape[0], -1).astype(jnp.bfloat16)
    z1 = jnp.dot(x, w1, preferred_element_type=jnp.float32) + b1
    h1 = jax.nn.sigmoid(z1)
    z2 = jnp.dot(h1.astype(jnp.bfloat16), w2, preferred_element_type=jnp.float32) + b2
    h2 = jax.nn.sigmoid(z2)
    z3 = jnp.dot(h2.astype(jnp.bfloat16), w3, preferred_element_type=jnp.float32) + b3
    return z3[:, :K_DF]


if __name__ == "__main__":
    key = jax.random.PRNGKey(0)
    k_x, k_p = jax.random.split(key)

    # MNIST-like input: batch=2, 1 channel, 28x28 (NCHW, as PyTorch would get).
    x = jax.random.normal(k_x, (2, 1, 28, 28), jnp.float32)
    params = init_params(k_p)

    logits = neural_network_forward(x, params)
    logits = jax.block_until_ready(logits)

    ref = _reference_forward(x, params)
    assert logits.shape == (2, K_DF), logits.shape
    assert bool(jnp.all(jnp.isfinite(logits))), "non-finite logits"
    # bf16 matmul inputs in both paths; sigmoid is exact (tanh form) -> tight-ish tol.
    assert jnp.allclose(logits, ref, atol=2e-2, rtol=2e-2), "mismatch vs reference"

    print("KERNEL_OK")
</pallas_src>

<mosaic_0001>
module attributes {stable_mosaic.version = 11 : i64} {
  func.func @_mlp_kernel(%arg0: i32, %arg1: memref<8x784xf32, #tpu.memory_space<vmem>>, %arg2: memref<784x384xbf16, #tpu.memory_space<vmem>>, %arg3: memref<1x384xf32, #tpu.memory_space<vmem>>, %arg4: memref<384x256xbf16, #tpu.memory_space<vmem>>, %arg5: memref<1x256xf32, #tpu.memory_space<vmem>>, %arg6: memref<256x128xbf16, #tpu.memory_space<vmem>>, %arg7: memref<1x128xf32, #tpu.memory_space<vmem>>, %arg8: memref<8x10xf32, #tpu.memory_space<vmem>>) attributes {dimension_semantics = [#tpu.dimension_semantics<parallel>], iteration_bounds = array<i64: 1>, scalar_prefetch = 0 : i64, scratch_operands = 0 : i64, tpu.core_type = #tpu.core_type<tc>, window_params = [{transform_indices = @transform_0, window_bounds = array<i64: 8, 784>}, {pipeline_mode = #tpu.pipeline_mode<synchronous>, transform_indices = @transform_1, window_bounds = array<i64: 784, 384>}, {pipeline_mode = #tpu.pipeline_mode<synchronous>, transform_indices = @transform_2, window_bounds = array<i64: 1, 384>}, {pipeline_mode = #tpu.pipeline_mode<synchronous>, transform_indices = @transform_3, window_bounds = array<i64: 384, 256>}, {pipeline_mode = #tpu.pipeline_mode<synchronous>, transform_indices = @transform_4, window_bounds = array<i64: 1, 256>}, {pipeline_mode = #tpu.pipeline_mode<synchronous>, transform_indices = @transform_5, window_bounds = array<i64: 256, 128>}, {pipeline_mode = #tpu.pipeline_mode<synchronous>, transform_indices = @transform_6, window_bounds = array<i64: 1, 128>}, {transform_indices = @transform_7, window_bounds = array<i64: 8, 10>}]} {
    %c0 = arith.constant 0 : index
    %c0_0 = arith.constant 0 : index
    %0 = vector.load %arg1[%c0, %c0_0] : memref<8x784xf32, #tpu.memory_space<vmem>>, vector<8x784xf32>
    %1 = arith.truncf %0 : vector<8x784xf32> to vector<8x784xbf16>
    %c0_1 = arith.constant 0 : index
    %c0_2 = arith.constant 0 : index
    %2 = vector.load %arg2[%c0_1, %c0_2] : memref<784x384xbf16, #tpu.memory_space<vmem>>, vector<784x384xbf16>
    %cst = arith.constant dense<0.000000e+00> : vector<8x384xf32>
    %3 = tpu.matmul %1, %2, %cst {dimension_numbers = #tpu.dot_dimension_numbers<[1], [0], [0], [1], [0, 0, 1, 1], [], []>} : vector<8x784xbf16>, vector<784x384xbf16>, vector<8x384xf32> -> vector<8x384xf32>
    %c0_3 = arith.constant 0 : index
    %c0_4 = arith.constant 0 : index
    %4 = vector.load %arg3[%c0_3, %c0_4] : memref<1x384xf32, #tpu.memory_space<vmem>>, vector<1x384xf32>
    %5 = vector.broadcast %4 : vector<1x384xf32> to vector<8x384xf32>
    %6 = arith.addf %3, %5 : vector<8x384xf32>
    %cst_5 = arith.constant 5.000000e-01 : f32
    %7 = vector.broadcast %cst_5 : f32 to vector<8x384xf32>
    %8 = arith.mulf %7, %6 : vector<8x384xf32>
    %9 = math.tanh %8 : vector<8x384xf32>
    %cst_6 = arith.constant 5.000000e-01 : f32
    %10 = vector.broadcast %cst_6 : f32 to vector<8x384xf32>
    %11 = arith.mulf %10, %9 : vector<8x384xf32>
    %cst_7 = arith.constant 5.000000e-01 : f32
    %12 = vector.broadcast %cst_7 : f32 to vector<8x384xf32>
    %13 = arith.addf %11, %12 : vector<8x384xf32>
    %14 = arith.truncf %13 : vector<8x384xf32> to vector<8x384xbf16>
    %c0_8 = arith.constant 0 : index
    %c0_9 = arith.constant 0 : index
    %15 = vector.load %arg4[%c0_8, %c0_9] : memref<384x256xbf16, #tpu.memory_space<vmem>>, vector<384x256xbf16>
    %cst_10 = arith.constant dense<0.000000e+00> : vector<8x256xf32>
    %16 = tpu.matmul %14, %15, %cst_10 {dimension_numbers = #tpu.dot_dimension_numbers<[1], [0], [0], [1], [0, 0, 1, 1], [], []>} : vector<8x384xbf16>, vector<384x256xbf16>, vector<8x256xf32> -> vector<8x256xf32>
    %c0_11 = arith.constant 0 : index
    %c0_12 = arith.constant 0 : index
    %17 = vector.load %arg5[%c0_11, %c0_12] : memref<1x256xf32, #tpu.memory_space<vmem>>, vector<1x256xf32>
    %18 = vector.broadcast %17 : vector<1x256xf32> to vector<8x256xf32>
    %19 = arith.addf %16, %18 : vector<8x256xf32>
    %cst_13 = arith.constant 5.000000e-01 : f32
    %20 = vector.broadcast %cst_13 : f32 to vector<8x256xf32>
    %21 = arith.mulf %20, %19 : vector<8x256xf32>
    %22 = math.tanh %21 : vector<8x256xf32>
    %cst_14 = arith.constant 5.000000e-01 : f32
    %23 = vector.broadcast %cst_14 : f32 to vector<8x256xf32>
    %24 = arith.mulf %23, %22 : vector<8x256xf32>
    %cst_15 = arith.constant 5.000000e-01 : f32
    %25 = vector.broadcast %cst_15 : f32 to vector<8x256xf32>
    %26 = arith.addf %24, %25 : vector<8x256xf32>
    %27 = arith.truncf %26 : vector<8x256xf32> to vector<8x256xbf16>
    %c0_16 = arith.constant 0 : index
    %c0_17 = arith.constant 0 : index
    %28 = vector.load %arg6[%c0_16, %c0_17] : memref<256x128xbf16, #tpu.memory_space<vmem>>, vector<256x128xbf16>
    %cst_18 = arith.constant dense<0.000000e+00> : vector<8x128xf32>
    %29 = tpu.matmul %27, %28, %cst_18 {dimension_numbers = #tpu.dot_dimension_numbers<[1], [0], [0], [1], [0, 0, 1, 1], [], []>} : vector<8x256xbf16>, vector<256x128xbf16>, vector<8x128xf32> -> vector<8x128xf32>
    %c0_19 = arith.constant 0 : index
    %c0_20 = arith.constant 0 : index
    %30 = vector.load %arg7[%c0_19, %c0_20] : memref<1x128xf32, #tpu.memory_space<vmem>>, vector<1x128xf32>
    %31 = vector.broadcast %30 : vector<1x128xf32> to vector<8x128xf32>
    %32 = arith.addf %29, %31 : vector<8x128xf32>
    %33 = vector.extract_strided_slice %32 {offsets = [0, 0], sizes = [8, 10], strides = [1, 1]} : vector<8x128xf32> to vector<8x10xf32>
    %c0_21 = arith.constant 0 : index
    %c0_22 = arith.constant 0 : index
    %34 = vector.load %arg8[%c0_21, %c0_22] : memref<8x10xf32, #tpu.memory_space<vmem>>, vector<8x10xf32>
    tpu.vector_store %arg8[%c0_21, %c0_22], %33 {strides = array<i32>} : memref<8x10xf32, #tpu.memory_space<vmem>>, vector<8x10xf32>,
    return
  }
  func.func @transform_0(%arg0: i32) -> (i32, i32) {
    %c0_i32 = arith.constant 0 : i32
    %c0_i32_0 = arith.constant 0 : i32
    return %arg0, %c0_i32 : i32, i32
  }
  func.func @transform_1(%arg0: i32) -> (i32, i32) {
    %c0_i32 = arith.constant 0 : i32
    %c0_i32_0 = arith.constant 0 : i32
    %c0_i32_1 = arith.constant 0 : i32
    return %c0_i32, %c0_i32_0 : i32, i32
  }
  func.func @transform_2(%arg0: i32) -> (i32, i32) {
    %c0_i32 = arith.constant 0 : i32
    %c0_i32_0 = arith.constant 0 : i32
    %c0_i32_1 = arith.constant 0 : i32
    return %c0_i32, %c0_i32_0 : i32, i32
  }
  func.func @transform_3(%arg0: i32) -> (i32, i32) {
    %c0_i32 = arith.constant 0 : i32
    %c0_i32_0 = arith.constant 0 : i32
    %c0_i32_1 = arith.constant 0 : i32
    return %c0_i32, %c0_i32_0 : i32, i32
  }
  func.func @transform_4(%arg0: i32) -> (i32, i32) {
    %c0_i32 = arith.constant 0 : i32
    %c0_i32_0 = arith.constant 0 : i32
    %c0_i32_1 = arith.constant 0 : i32
    return %c0_i32, %c0_i32_0 : i32, i32
  }
  func.func @transform_5(%arg0: i32) -> (i32, i32) {
    %c0_i32 = arith.constant 0 : i32
    %c0_i32_0 = arith.constant 0 : i32
    %c0_i32_1 = arith.constant 0 : i32
    return %c0_i32, %c0_i32_0 : i32, i32
  }
  func.func @transform_6(%arg0: i32) -> (i32, i32) {
    %c0_i32 = arith.constant 0 : i32
    %c0_i32_0 = arith.constant 0 : i32
    %c0_i32_1 = arith.constant 0 : i32
    return %c0_i32, %c0_i32_0 : i32, i32
  }
  func.func @transform_7(%arg0: i32) -> (i32, i32) {
    %c0_i32 = arith.constant 0 : i32
    %c0_i32_0 = arith.constant 0 : i32
    return %arg0, %c0_i32 : i32, i32
  }
}

</mosaic_0001>

<bundles_post_ra>
// kernel: tpu_custom_call.1
= control target key start
LH: loop header
LB: loop body
LE: loop exit
PB: predicated region body
PF: predicated region fallthrough
CT: control target
= control target key end

     0   :  { %12 = vsyncpa [#allocation3], 0  ;;  %s2870_s0 = inlined_call_operand.hbm [shape: f32[8,784], index: 0, kind: input, shape index: {}]   ;;  %s2871_s1 = inlined_call_operand.hbm [shape: bf16[784,384], index: 1, kind: input, shape index: {}]   ;;  %s2872_s2 = inlined_call_operand.vmem [shape: f32[1,384], index: 2, kind: input, shape index: {}]   ;;  %s2873_s3 = inlined_call_operand.hbm [shape: bf16[384,256], index: 3, kind: input, shape index: {}]   ;;  %s2874_s4 = inlined_call_operand.vmem [shape: f32[1,256], index: 4, kind: input, shape index: {}]   ;;  %s2875_s5 = inlined_call_operand.hbm [shape: bf16[256,128], index: 5, kind: input, shape index: {}]   ;;  %s2876_s6 = inlined_call_operand.vmem [shape: f32[1,128], index: 6, kind: input, shape index: {}]   ;;  %s2877_s7 = inlined_call_operand.hbm [shape: f32[8,10], index: 7, kind: output, shape index: {}]  }
   0x1   :  { %13 = vsyncpa [#allocation6], 0 }
   0x2   :  { %14 = vsyncpa [#allocation9], 0 }
   0x3   :  { %15 = vsyncpa [#allocation4], 0  ;;  %s2747_s24 = smov [#allocation5]  }
   0x4   :  { %s31_s25 = sshll.u32 %s2747_s24, 4  ;;  %s32_s25 = int_to_ptr.vmem [resolvable:$true] %s31_s25 }
   0x5   :  { %s2647_s26 = scalar_lea.vmem %s32_s25, 18816  ;;  %p2652_p1 = scmp.lt.s32.totalorder %s32_s25, %s32_s25 }
   0x6   :  { %p2648_p0 = scmp.ne.s32.totalorder %s32_s25, %s2647_s26  ;;  %p2653_p2 = scmp.lt.s32.totalorder %s2647_s26, %s2647_s26 }
   0x8   :  { %p2654_p3 = por %p2653_p2, %p2652_p1 }
   0xa   :  { %p2655_p4 = pnand %p2654_p3, %p2648_p0 }
   0xc   :  { %2658 = shalt.err (!%p2655_p4)
}
   0xd   :  { %s2748_s27 = smov 192   ;;  %s2749_s28 = smov 12  }
   0xe   :  { %37 = dma.hbm_to_vmem [thread:$0]  %s2871_s1, 18816, %s32_s25, [#allocation6], %s2748_s27, %s2748_s27, %s2749_s28  }
   0xf   :  { %s2750_s8 = smov [#allocation2]   ;;  %s2751_s10 = smov [#allocation7]  }
  0x10   :  { %s22_s9 = sshll.u32 %s2750_s8, 4  ;;  %s45_s11 = sshll.u32 %s2751_s10, 4  ;;  %s23_s9 = int_to_ptr.vmem [resolvable:$true] %s22_s9  ;;  %s46_s11 = int_to_ptr.vmem [resolvable:$true] %s45_s11 }
  0x11   :  { %s2667_s12 = scalar_lea.vmem %s23_s9, 896  ;;  %p2672_p6 = scmp.lt.s32.totalorder %s23_s9, %s23_s9 }
  0x12   :  { %p2668_p5 = scmp.ne.s32.totalorder %s23_s9, %s2667_s12  ;;  %p2673_p7 = scmp.lt.s32.totalorder %s2667_s12, %s2667_s12 }
  0x14   :  { %p2674_p8 = por %p2673_p7, %p2672_p6 }
  0x16   :  { %p2675_p9 = pnand %p2674_p8, %p2668_p5 }
  0x18   :  { %2678 = shalt.err (!%p2675_p9)
}
  0x19   :  { %25 = dma.hbm_to_vmem [thread:$0]  %s2870_s0, 896, %s23_s9, [#allocation3]  }
  0x1a   :  { %s2687_s15 = scalar_lea.vmem %s46_s11, 6144  ;;  %p2692_p11 = scmp.lt.s32.totalorder %s46_s11, %s46_s11 }
  0x1b   :  { %p2688_p10 = scmp.ne.s32.totalorder %s46_s11, %s2687_s15  ;;  %p2693_p12 = scmp.lt.s32.totalorder %s2687_s15, %s2687_s15 }
  0x1d   :  { %p2694_p13 = por %p2693_p12, %p2692_p11 }
  0x1f   :  { %p2695_p0 = pnand %p2694_p13, %p2688_p10 }
  0x21   :  { %2698 = shalt.err (!%p2695_p0)
}
  0x22   :  { %s2752_s1 = smov 128   ;;  %s2753_s16 = smov 8  }
  0x23   :  { %51 = dma.hbm_to_vmem [thread:$0]  %s2873_s3, 6144, %s46_s11, [#allocation6], %s2752_s1, %s2752_s1, %s2753_s16  }
  0x24   :  { %s2754_s19 = smov [#allocation8]  }
  0x25   :  { %s59_s20 = sshll.u32 %s2754_s19, 4  ;;  %s60_s20 = int_to_ptr.vmem [resolvable:$true] %s59_s20 }
  0x26   :  { %s2707_s21 = scalar_lea.vmem %s60_s20, 2048  ;;  %p2712_p2 = scmp.lt.s32.totalorder %s60_s20, %s60_s20 }
  0x27   :  { %p2708_p1 = scmp.ne.s32.totalorder %s60_s20, %s2707_s21  ;;  %p2713_p3 = scmp.lt.s32.totalorder %s2707_s21, %s2707_s21 }
  0x29   :  { %p2714_p4 = por %p2713_p3, %p2712_p2 }
  0x2b   :  { %p2715_p5 = pnand %p2714_p4, %p2708_p1 }
  0x2d   :  { %2718 = shalt.err (!%p2715_p5)
}
  0x2e   :  { %s2755_s0 = smov 64   ;;  %s2756_s22 = smov 4  }
  0x2f   :  { %65 = dma.hbm_to_vmem [thread:$0]  %s2875_s5, 2048, %s60_s20, [#allocation9], %s2755_s0, %s2755_s0, %s2756_s22  }
  0x30   :  { %2739 = dma.done.wait [#allocation3], 896  }
  0x31   :  { %2740 = vsyncadd [#allocation3], 4294966400 }
  0x32   :  { %2741 = dma.done.wait [#allocation6], 24960  }
  0x33   :  { %2742 = vsyncadd [#allocation6], 4294942336 }
  0x34   :  { %2743 = dma.done.wait [#allocation9], 2048  }
  0x35   :  { %2744 = vsyncadd [#allocation9], 4294965248  ;;  %v2345_v0 = vld [vmem:[#allocation5 + $0xac] ss:$12 sps:$4 sm:$0xff]   ;;  %v2349_v2 = vld [vmem:[#allocation5 + $0xa8] ss:$12 sps:$4 sm:$0xff]  }
  0x36   :  { %v2347_v1 = vld [vmem:[#allocation5 + $0x22c] ss:$12 sps:$4 sm:$0xff]   ;;  %1096 = vmatprep.subr.bf16.mxu0 %v2345_v0  ;;  %v2350_v3 = vld [vmem:[#allocation5 + $0x228] ss:$12 sps:$4 sm:$0xff]   ;;  %v2355_v6 = vld [vmem:[#allocation5 + $0x90] ss:$12 sps:$4 sm:$0xff]  }
  0x37   :  { %1137 = vmatprep.subr.bf16.mxu1 %v2347_v1  ;;  %v2351_v4 = vld [vmem:[#allocation5 + $0x94] ss:$12 sps:$4 sm:$0xff]   ;;  %1097 = vmatpush1.bf16.msra.mxu0 %v2349_v2  ;;  %v2356_v7 = vld [vmem:[#allocation5 + $0x210] ss:$12 sps:$4 sm:$0xff]   ;;  %v2361_v10 = vld [vmem:[#allocation5 + $0x78] ss:$12 sps:$4 sm:$0xff]  }
  0x38   :  { %1138 = vmatpush1.bf16.msra.mxu1 %v2350_v3  ;;  %v2353_v5 = vld [vmem:[#allocation5 + $0x214] ss:$12 sps:$4 sm:$0xff]   ;;  %1098 = vmatprep.subr.bf16.mxu0 %v2351_v4  ;;  %v2357_v8 = vld [vmem:[#allocation5 + $0x7c] ss:$12 sps:$4 sm:$0xff]   ;;  %v2362_v11 = vld [vmem:[#allocation5 + $0x1f8] ss:$12 sps:$4 sm:$0xff]  }
  0x39   :  { %1139 = vmatprep.subr.bf16.mxu1 %v2353_v5  ;;  %v2359_v9 = vld [vmem:[#allocation5 + $0x1fc] ss:$12 sps:$4 sm:$0xff]   ;;  %v2363_v12 = vld [vmem:[#allocation5 + $0x64] ss:$12 sps:$4 sm:$0xff]   ;;  %v2367_v14 = vld [vmem:[#allocation5 + $0x60] ss:$12 sps:$4 sm:$0xff]  }
  0x3a   :  { %v2365_v13 = vld [vmem:[#allocation5 + $0x1e4] ss:$12 sps:$4 sm:$0xff]   ;;  %v2368_v15 = vld [vmem:[#allocation5 + $0x1e0] ss:$12 sps:$4 sm:$0xff]   ;;  %v2373_v18 = vld [vmem:[#allocation5 + $0x48] ss:$12 sps:$4 sm:$0xff]  }
  0x3b   :  { %1099 = vmatpush1.bf16.msra.mxu0 %v2355_v6  ;;  %v2369_v16 = vld [vmem:[#allocation5 + $0x4c] ss:$12 sps:$4 sm:$0xff]   ;;  %v2374_v19 = vld [vmem:[#allocation5 + $0x1c8] ss:$12 sps:$4 sm:$0xff]   ;;  %v2379_v22 = vld [vmem:[#allocation5 + $0x30] ss:$12 sps:$4 sm:$0xff]  }
  0x3c   :  { %1140 = vmatpush1.bf16.msra.mxu1 %v2356_v7  ;;  %1100 = vmatprep.subr.bf16.mxu0 %v2357_v8  ;;  %v2371_v17 = vld [vmem:[#allocation5 + $0x1cc] ss:$12 sps:$4 sm:$0xff]   ;;  %v2375_v20 = vld [vmem:[#allocation5 + $0x34] ss:$12 sps:$4 sm:$0xff]   ;;  %v2380_v23 = vld [vmem:[#allocation5 + $0x1b0] ss:$12 sps:$4 sm:$0xff]  }
  0x3d   :  { %1141 = vmatprep.subr.bf16.mxu1 %v2359_v9  ;;  %v2377_v21 = vld [vmem:[#allocation5 + $0x1b4] ss:$12 sps:$4 sm:$0xff]   ;;  %v2381_v24 = vld [vmem:[#allocation5 + $0x1c] ss:$12 sps:$4 sm:$0xff]   ;;  %v2385_v26 = vld [vmem:[#allocation5 + $0x18] ss:$12 sps:$4 sm:$0xff]  }
  0x3e   :  { %v2383_v25 = vld [vmem:[#allocation5 + $0x19c] ss:$12 sps:$4 sm:$0xff]   ;;  %v2386_v27 = vld [vmem:[#allocation5 + $0x198] ss:$12 sps:$4 sm:$0xff]   ;;  %v2391_v30 = vld [vmem:[#allocation5] ss:$12 sps:$4 sm:$0xff]  }
  0x3f   :  { %1101 = vmatpush1.bf16.msra.mxu0 %v2361_v10  ;;  %v2387_v28 = vld [vmem:[#allocation5 + $0x4] ss:$12 sps:$4 sm:$0xff]   ;;  %v2392_v31 = vld [vmem:[#allocation5 + $0x180] ss:$12 sps:$4 sm:$0xff]   ;;  %v2397_v34 = vld [vmem:[#allocation5 + $0x168] ss:$12 sps:$4 sm:$0xff]  }
  0x40   :  { %1142 = vmatpush1.bf16.msra.mxu1 %v2362_v11  ;;  %1102 = vmatprep.subr.bf16.mxu0 %v2363_v12  ;;  %v2389_v29 = vld [vmem:[#allocation5 + $0x184] ss:$12 sps:$4 sm:$0xff]   ;;  %v2393_v32 = vld [vmem:[#allocation5 + $0x16c] ss:$12 sps:$4 sm:$0xff]   ;;  %v2398_v35 = vld [vmem:[#allocation5 + $0x2e8] ss:$12 sps:$4 sm:$0xff]  }
  0x41   :  { %1143 = vmatprep.subr.bf16.mxu1 %v2365_v13  ;;  %v2395_v33 = vld [vmem:[#allocation5 + $0x2ec] ss:$12 sps:$4 sm:$0xff]   ;;  %v2399_v36 = vld [vmem:[#allocation5 + $0x154] ss:$12 sps:$4 sm:$0xff]   ;;  %v2403_v38 = vld [vmem:[#allocation5 + $0x150] ss:$12 sps:$4 sm:$0xff]  }
  0x42   :  { %v2401_v37 = vld [vmem:[#allocation5 + $0x2d4] ss:$12 sps:$4 sm:$0xff]   ;;  %v2404_v39 = vld [vmem:[#allocation5 + $0x2d0] ss:$12 sps:$4 sm:$0xff]   ;;  %v2409_v42 = vld [vmem:[#allocation5 + $0x138] ss:$12 sps:$4 sm:$0xff]  }
  0x43   :  { %1103 = vmatpush1.bf16.msra.mxu0 %v2367_v14  ;;  %v2405_v40 = vld [vmem:[#allocation5 + $0x13c] ss:$12 sps:$4 sm:$0xff]   ;;  %v2410_v43 = vld [vmem:[#allocation5 + $0x2b8] ss:$12 sps:$4 sm:$0xff]   ;;  %v82_v46 = vld [vmem:[#allocation2 + $0x8] sm:$0xff]  ;;  %vm1092_vm0 = vcmask 130048  }
  0x44   :  { %1144 = vmatpush1.bf16.msra.mxu1 %v2368_v15  ;;  %1104 = vmatprep.subr.bf16.mxu0 %v2369_v16  ;;  %v2407_v41 = vld [vmem:[#allocation5 + $0x2bc] ss:$12 sps:$4 sm:$0xff]   ;;  %v2411_v44 = vld [vmem:[#allocation5 + $0x124] ss:$12 sps:$4 sm:$0xff]   ;;  %v2415_v47 = vld [vmem:[#allocation5 + $0x120] ss:$12 sps:$4 sm:$0xff]   ;;  %v2813_v49 = vpack.c.bf16 %v82_v46, %v82_v46 }
  0x45   :  { %1145 = vmatprep.subr.bf16.mxu1 %v2371_v17  ;;  %v2413_v45 = vld [vmem:[#allocation5 + $0x2a4] ss:$12 sps:$4 sm:$0xff]   ;;  %v2416_v48 = vld [vmem:[#allocation5 + $0x2a0] ss:$12 sps:$4 sm:$0xff]   ;;  %v2421_v54 = vld [vmem:[#allocation5 + $0x108] ss:$12 sps:$4 sm:$0xff]  }
  0x46   :  { %v84_v50 = vld [vmem:[#allocation2 + $0x18] sm:$0xff]  ;;  %v2417_v51 = vld [vmem:[#allocation5 + $0x10c] ss:$12 sps:$4 sm:$0xff]   ;;  %1128 = vmatprep.mubr.bf16.mxu0 %v2813_v49  ;;  %v2422_v55 = vld [vmem:[#allocation5 + $0x288] ss:$12 sps:$4 sm:$0xff]   ;;  %v2757_v16 = vmov 0  }
  0x47   :  { %1105 = vmatpush1.bf16.msra.mxu0 %v2373_v18  ;;  %v2815_v52 = vpack.c.bf16 %v84_v50, %v84_v50  ;;  %v2419_v53 = vld [vmem:[#allocation5 + $0x28c] ss:$12 sps:$4 sm:$0xff]   ;;  %v2423_v56 = vld [vmem:[#allocation5 + $0xf4] ss:$12 sps:$4 sm:$0xff]   ;;  %v2427_v58 = vld [vmem:[#allocation5 + $0xf0] ss:$12 sps:$4 sm:$0xff]  }
  0x48   :  { %1146 = vmatpush1.bf16.msra.mxu1 %v2374_v19  ;;  %1106 = vmatprep.subr.bf16.mxu0 %v2375_v20  ;;  %v2425_v57 = vld [vmem:[#allocation5 + $0x274] ss:$12 sps:$4 sm:$0xff]   ;;  %v2428_v59 = vld [vmem:[#allocation5 + $0x270] ss:$12 sps:$4 sm:$0xff]   ;;  %v2433_v62 = vld [vmem:[#allocation5 + $0xd8] ss:$12 sps:$4 sm:$0xff]  }
  0x49   :  { %1147 = vmatprep.subr.bf16.mxu1 %v2377_v21  ;;  %1169 = vmatprep.mubr.bf16.mxu1 %v2815_v52  ;;  %v2429_v60 = vld [vmem:[#allocation5 + $0xdc] ss:$12 sps:$4 sm:$0xff]   ;;  %v2434_v63 = vld [vmem:[#allocation5 + $0x258] ss:$12 sps:$4 sm:$0xff]   ;;  %v2439_v2 = vld [vmem:[#allocation5 + $0xc0] ss:$12 sps:$4 sm:$0xff]  }
  0x4a   :  { %v2431_v61 = vld [vmem:[#allocation5 + $0x25c] ss:$12 sps:$4 sm:$0xff]   ;;  %v2435_v0 = vld [vmem:[#allocation5 + $0xc4] ss:$12 sps:$4 sm:$0xff]   ;;  %v2440_v3 = vld [vmem:[#allocation5 + $0x240] ss:$12 sps:$4 sm:$0xff]  }
  0x4b   :  { %1107 = vmatpush1.bf16.msra.mxu0 %v2379_v22  ;;  %v2437_v1 = vld [vmem:[#allocation5 + $0x244] ss:$12 sps:$4 sm:$0xff]   ;;  %v81_v4 = vld [vmem:[#allocation2] sm:$0xff]  ;;  %v83_v5 = vld [vmem:[#allocation2 + $0x10] sm:$0xff]  ;;  %vm2759_vm1 = vmmov 0   ;;  %s2760_s27 = smov [#allocation10]  }
  0x4c   :  { %1148 = vmatpush1.bf16.msra.mxu1 %v2380_v23  ;;  %1108 = vmatprep.subr.bf16.mxu0 %v2381_v24  ;;  %v2443_v6 = vld [vmem:[#allocation5 + $0x3ac] ss:$12 sps:$4 sm:$0xff]   ;;  %v2446_v7 = vld [vmem:[#allocation5 + $0x484] ss:$12 sps:$4 sm:$0xff]   ;;  %v2819_v8 = vpack.c.bf16 %v81_v4, %v81_v4  ;;  %v2821_v9 = vpack.c.bf16 %v83_v5, %v83_v5  ;;  %v2441_v10 = vld [vmem:[#allocation5 + $0x3a8] ss:$12 sps:$4 sm:$0xff]  }
  0x4d   :  { %1149 = vmatprep.subr.bf16.mxu1 %v2383_v25  ;;  %v2444_v11 = vld [vmem:[#allocation5 + $0x480] ss:$12 sps:$4 sm:$0xff]   ;;  %v2450_v13 = vld [vmem:[#allocation5 + $0x170] ss:$12 sps:$4 sm:$0xff]   ;;  %v2451_v18 = vld [vmem:[#allocation5 + $0x378] ss:$12 sps:$4 sm:$0xff]  }
  0x4e   :  { %v2449_v12 = vld [vmem:[#allocation5 + $0x394] ss:$12 sps:$4 sm:$0xff]   ;;  %v2447_v14 = vld [vmem:[#allocation5 + $0x390] ss:$12 sps:$4 sm:$0xff]   ;;  %v2455_v21 = vld [vmem:[#allocation5 + $0x158] ss:$12 sps:$4 sm:$0xff]  }
  0x4f   :  { %1109 = vmatpush1.bf16.msra.mxu0 %v2385_v26  ;;  %v87_v15 = vld [vmem:[#allocation2 + $0x30] sm:$0xff]  ;;  %v2458_v22 = vld [vmem:[#allocation5 + $0x364] ss:$12 sps:$4 sm:$0xff]   ;;  %v2456_v23 = vld [vmem:[#allocation5 + $0x360] ss:$12 sps:$4 sm:$0xff]   ;;  %s2010_s28 = sshll.u32 %s2760_s27, 4  ;;  %s2011_s28 = int_to_ptr.vmem [resolvable:$true] %s2010_s28 }
  0x50   :  { %1150 = vmatpush1.bf16.msra.mxu1 %v2386_v27  ;;  %1110 = vmatprep.subr.bf16.mxu0 %v2387_v28  ;;  %v2453_v17 = vld [vmem:[#allocation5 + $0x37c] ss:$12 sps:$4 sm:$0xff]   ;;  %v2826_v19 = vpack.c.bf16 %v87_v15, %v87_v15  ;;  %v2459_v24 = vld [vmem:[#allocation5 + $0x98] ss:$12 sps:$4 sm:$0xff]   ;;  %v2460_v25 = vld [vmem:[#allocation5 + $0x140] ss:$12 sps:$4 sm:$0xff]   ;;  %p2724_p7 = scmp.lt.s32.totalorder %s2011_s28, %s2011_s28 }
  0x51   :  { %1151 = vmatprep.subr.bf16.mxu1 %v2389_v29  ;;  %v2454_v20 = vld [vmem:[#allocation5 + $0xb0] ss:$12 sps:$4 sm:$0xff]   ;;  %v2463_v26 = vld [vmem:[#allocation5 + $0x34c] ss:$12 sps:$4 sm:$0xff]   ;;  %v2461_v27 = vld [vmem:[#allocation5 + $0x348] ss:$12 sps:$4 sm:$0xff]  }
  0x52   :  { %v2464_v28 = vld [vmem:[#allocation5 + $0x80] ss:$12 sps:$4 sm:$0xff]   ;;  %v2465_v29 = vld [vmem:[#allocation5 + $0x128] ss:$12 sps:$4 sm:$0xff]   ;;  %v2510_v4 = vld [vmem:[#allocation5 + $0x290] ss:$12 sps:$4 sm:$0xff]  }
  0x53   :  { %1111 = vmatpush1.bf16.msra.mxu0 %v2391_v30  ;;  %v2468_v30 = vld [vmem:[#allocation5 + $0x334] ss:$12 sps:$4 sm:$0xff]   ;;  %v2513_v5 = vld [vmem:[#allocation5 + $0x3dc] ss:$12 sps:$4 sm:$0xff]   ;;  %vm2002_vm2 = vcmask 80896   ;;  %s2719_s29 = scalar_lea.vmem %s2011_s28, 128 }
  0x54   :  { %1152 = vmatpush1.bf16.msra.mxu1 %v2392_v31  ;;  %1112 = vmatprep.subr.bf16.mxu0 %v2393_v32  ;;  %v2466_v31 = vld [vmem:[#allocation5 + $0x330] ss:$12 sps:$4 sm:$0xff]   ;;  %v2469_v32 = vld [vmem:[#allocation5 + $0x68] ss:$12 sps:$4 sm:$0xff]   ;;  %v2521_v15 = vld [vmem:[#allocation5 + $0x1a0] ss:$12 sps:$4 sm:$0xff]   ;;  %p2720_p6 = scmp.ne.s32.totalorder %s2011_s28, %s2719_s29  ;;  %p2725_p8 = scmp.lt.s32.totalorder %s2719_s29, %s2719_s29 }
  0x55   :  { %1153 = vmatprep.subr.bf16.mxu1 %v2395_v33  ;;  %v2470_v33 = vld [vmem:[#allocation5 + $0x110] ss:$12 sps:$4 sm:$0xff]   ;;  %v2485_v46 = vld [vmem:[#allocation5 + $0xc8] ss:$12 sps:$4 sm:$0xff]  }
  0x56   :  { %v2489_v50 = vld [vmem:[#allocation5 + $0x8] ss:$12 sps:$4 sm:$0xff]   ;;  %p2726_p9 = por %p2725_p8, %p2724_p7 }
  0x57   :  { %1113 = vmatpush2.bf16.msra.mxu0 %v2397_v34  ;;  %v2473_v34 = vld [vmem:[#allocation5 + $0x31c] ss:$12 sps:$4 sm:$0xff]  }
  0x58   :  { %1154 = vmatpush2.bf16.msra.mxu1 %v2398_v35  ;;  %1114 = vmatprep.subr.bf16.mxu0 %v2399_v36  ;;  %v2471_v35 = vld [vmem:[#allocation5 + $0x318] ss:$12 sps:$4 sm:$0xff]   ;;  %v2474_v36 = vld [vmem:[#allocation5 + $0x50] ss:$12 sps:$4 sm:$0xff]   ;;  %p2727_p10 = pnand %p2726_p9, %p2720_p6 }
  0x59   :  { %1155 = vmatprep.subr.bf16.mxu1 %v2401_v37  ;;  %v2475_v37 = vld [vmem:[#allocation5 + $0xf8] ss:$12 sps:$4 sm:$0xff]  }
  0x5b   :  { %1115 = vmatpush2.bf16.msra.mxu0 %v2403_v38  ;;  %v2478_v38 = vld [vmem:[#allocation5 + $0x304] ss:$12 sps:$4 sm:$0xff]  }
  0x5c   :  { %1156 = vmatpush2.bf16.msra.mxu1 %v2404_v39  ;;  %1116 = vmatprep.subr.bf16.mxu0 %v2405_v40  ;;  %v2476_v39 = vld [vmem:[#allocation5 + $0x300] ss:$12 sps:$4 sm:$0xff]   ;;  %v2479_v40 = vld [vmem:[#allocation5 + $0x38] ss:$12 sps:$4 sm:$0xff]  }
  0x5d   :  { %1157 = vmatprep.subr.bf16.mxu1 %v2407_v41  ;;  %v2480_v41 = vld [vmem:[#allocation5 + $0xe0] ss:$12 sps:$4 sm:$0xff]  }
  0x5f   :  { %1117 = vmatpush2.bf16.msra.mxu0 %v2409_v42  ;;  %v2483_v42 = vld [vmem:[#allocation5 + $0x46c] ss:$12 sps:$4 sm:$0xff]  }
  0x60   :  { %1158 = vmatpush2.bf16.msra.mxu1 %v2410_v43  ;;  %1118 = vmatprep.subr.bf16.mxu0 %v2411_v44  ;;  %v2481_v43 = vld [vmem:[#allocation5 + $0x468] ss:$12 sps:$4 sm:$0xff]  }
  0x61   :  { %1159 = vmatprep.subr.bf16.mxu1 %v2413_v45  ;;  %v86_v44 = vld [vmem:[#allocation2 + $0x28] sm:$0xff]  ;;  %v2484_v45 = vld [vmem:[#allocation5 + $0x20] ss:$12 sps:$4 sm:$0xff]  }
  0x63   :  { %1119 = vmatpush2.bf16.msra.mxu0 %v2415_v47  ;;  %v2831_v47 = vpack.c.bf16 %v86_v44, %v86_v44  ;;  %v2555_v44 = vld [vmem:[#allocation7 + $0x34] ss:$8 sps:$4 sm:$0xff]  }
  0x64   :  { %1160 = vmatpush2.bf16.msra.mxu1 %v2416_v48  ;;  %1120 = vmatprep.subr.bf16.mxu0 %v2417_v51  ;;  %v2488_v48 = vld [vmem:[#allocation5 + $0x454] ss:$12 sps:$4 sm:$0xff]   ;;  %v2490_v51 = vld [vmem:[#allocation5 + $0x2f0] ss:$12 sps:$4 sm:$0xff]  }
  0x65   :  { %1161 = vmatprep.subr.bf16.mxu1 %v2419_v53  ;;  %v2493_v53 = vld [vmem:[#allocation5 + $0x43c] ss:$12 sps:$4 sm:$0xff]  }
  0x67   :  { %1121 = vmatpush2.bf16.msra.mxu0 %v2421_v54  ;;  %v2491_v54 = vld [vmem:[#allocation5 + $0x438] ss:$12 sps:$4 sm:$0xff]  }
  0x68   :  { %1162 = vmatpush2.bf16.msra.mxu1 %v2422_v55  ;;  %1122 = vmatprep.subr.bf16.mxu0 %v2423_v56  ;;  %v2494_v55 = vld [vmem:[#allocation5 + $0x230] ss:$12 sps:$4 sm:$0xff]   ;;  %v2495_v56 = vld [vmem:[#allocation5 + $0x2d8] ss:$12 sps:$4 sm:$0xff]  }
  0x69   :  { %1163 = vmatprep.subr.bf16.mxu1 %v2425_v57  ;;  %v2498_v57 = vld [vmem:[#allocation5 + $0x424] ss:$12 sps:$4 sm:$0xff]  }
  0x6b   :  { %1123 = vmatpush2.bf16.msra.mxu0 %v2427_v58  ;;  %v2496_v58 = vld [vmem:[#allocation5 + $0x420] ss:$12 sps:$4 sm:$0xff]  }
  0x6c   :  { %1164 = vmatpush2.bf16.msra.mxu1 %v2428_v59  ;;  %1124 = vmatprep.subr.bf16.mxu0 %v2429_v60  ;;  %v2499_v59 = vld [vmem:[#allocation5 + $0x218] ss:$12 sps:$4 sm:$0xff]   ;;  %v2500_v60 = vld [vmem:[#allocation5 + $0x2c0] ss:$12 sps:$4 sm:$0xff]  }
  0x6d   :  { %1165 = vmatprep.subr.bf16.mxu1 %v2431_v61  ;;  %v2503_v61 = vld [vmem:[#allocation5 + $0x40c] ss:$12 sps:$4 sm:$0xff]  }
  0x6f   :  { %1125 = vmatpush2.bf16.msra.mxu0 %v2433_v62  ;;  %v2501_v62 = vld [vmem:[#allocation5 + $0x408] ss:$12 sps:$4 sm:$0xff]  }
  0x70   :  { %1166 = vmatpush2.bf16.msra.mxu1 %v2434_v63  ;;  %1126 = vmatprep.subr.bf16.mxu0 %v2435_v0  ;;  %v2504_v63 = vld [vmem:[#allocation5 + $0x200] ss:$12 sps:$4 sm:$0xff]   ;;  %v2505_v0 = vld [vmem:[#allocation5 + $0x2a8] ss:$12 sps:$4 sm:$0xff]  }
  0x71   :  { %1167 = vmatprep.subr.bf16.mxu1 %v2437_v1  ;;  %v2508_v1 = vld [vmem:[#allocation5 + $0x3f4] ss:$12 sps:$4 sm:$0xff]  }
  0x73   :  { %1127 = vmatpush2.bf16.msra.mxu0 %v2439_v2  ;;  %v2506_v2 = vld [vmem:[#allocation5 + $0x3f0] ss:$12 sps:$4 sm:$0xff]  }
  0x74   :  { %1168 = vmatpush2.bf16.msra.mxu1 %v2440_v3  ;;  %1178 = vmatprep.subr.bf16.mxu0 %v2443_v6  ;;  %v2509_v3 = vld [vmem:[#allocation5 + $0x1e8] ss:$12 sps:$4 sm:$0xff]   ;;  %v2511_v6 = vld [vmem:[#allocation5 + $0x3d8] ss:$12 sps:$4 sm:$0xff]  }
  0x75   :  { %1233 = vmatprep.subr.bf16.mxu1 %v2446_v7  ;;  %v2514_v7 = vld [vmem:[#allocation5 + $0x1d0] ss:$12 sps:$4 sm:$0xff]  }
  0x76   :  { %1129 = vmatmul.mubr.bf16.vlgmr.msra.gmra.mxu0 %v2819_v8 }
  0x77   :  { %1170 = vmatmul.mubr.bf16.vlgmr.msra.gmra.mxu1 %v2821_v9  ;;  %1179 = vmatpush1.bf16.msra.mxu0 %v2441_v10  ;;  %v2518_v10 = vld [vmem:[#allocation5 + $0x3c4] ss:$12 sps:$4 sm:$0xff]  }
  0x78   :  { %1234 = vmatpush1.bf16.msra.mxu1 %v2444_v11  ;;  %1180 = vmatprep.subr.bf16.mxu0 %v2449_v12  ;;  %v2519_v11 = vld [vmem:[#allocation5 + $0x1b8] ss:$12 sps:$4 sm:$0xff]   ;;  %v85_v12 = vld [vmem:[#allocation2 + $0x20] sm:$0xff] }
  0x79   :  { %1251 = vmatprep.mubr.bf16.mxu1 %v2757_v16  ;;  %2235 = vmatprep.subr.bf16.mxu1 %v2450_v13  ;;  %v2520_v13 = vld [vmem:[#allocation5 + $0x260] ss:$12 sps:$4 sm:$0xff]  }
  0x7a   :  { %1210 = vmatprep.mubr.bf16.mxu0 %v2831_v47 }
  0x7b   :  { %1181 = vmatpush1.bf16.msra.mxu0 %v2447_v14  ;;  %v2522_v14 = vld [vmem:[#allocation5 + $0x470] ss:$12 sps:$4 sm:$0xff]  }
  0x7c   :  { %1182 = vmatprep.subr.bf16.mxu0 %v2453_v17  ;;  %v2523_v17 = vld [vmem:[#allocation5 + $0x3b0] ss:$12 sps:$4 sm:$0xff]  }
  0x7f   :  { %2168 = vmatmul.mubr.msk.bf16.vlgmr.msra.gmra.mxu1 %vm1092_vm0, %v2826_v19  ;;  %1183 = vmatpush1.bf16.msra.mxu0 %v2451_v18  ;;  %v2836_v18 = vpack.c.bf16 %v85_v12, %v85_v12  ;;  %v2603_v12 = vld [vmem:[#allocation7 + $0x134] ss:$8 sps:$4 sm:$0xff]  }
  0x80   :  { %2236 = vmatpush3.bf16.msra.mxu1 %v2454_v20  ;;  %1184 = vmatprep.subr.bf16.mxu0 %v2458_v22  ;;  %v2524_v20 = vld [vmem:[#allocation5 + $0x248] ss:$12 sps:$4 sm:$0xff]  }
  0x81   :  { %2237 = vmatprep.subr.bf16.mxu1 %v2455_v21  ;;  %1292 = vmatprep.mubr.bf16.mxu1 %v2813_v49  ;;  %v2486_v49 = vld [vmem:[#allocation5 + $0x450] ss:$12 sps:$4 sm:$0xff]   ;;  %v2526_v21 = vld [vmem:[#allocation5 + $0x458] ss:$12 sps:$4 sm:$0xff]   ;;  %v2525_v22 = vld [vmem:[#allocation5 + $0x188] ss:$12 sps:$4 sm:$0xff]  }
  0x83   :  { %1185 = vmatpush1.bf16.msra.mxu0 %v2456_v23  ;;  %v2527_v23 = vld [vmem:[#allocation5 + $0x398] ss:$12 sps:$4 sm:$0xff]  }
  0x84   :  { %2238 = vmatpush3.bf16.msra.mxu1 %v2459_v24  ;;  %1186 = vmatprep.subr.bf16.mxu0 %v2463_v26  ;;  %v2528_v24 = vld [vmem:[#allocation5 + $0x440] ss:$12 sps:$4 sm:$0xff]   ;;  %v2540_v26 = vld [vmem:[#allocation5 + $0x488] ss:$12 sps:$4 sm:$0xff]  }
  0x85   :  { %2239 = vmatprep.subr.bf16.mxu1 %v2460_v25  ;;  %v2529_v25 = vld [vmem:[#allocation5 + $0x380] ss:$12 sps:$4 sm:$0xff]  }
  0x87   :  { %1187 = vmatpush1.bf16.msra.mxu0 %v2461_v27  ;;  %v2530_v27 = vld [vmem:[#allocation5 + $0x428] ss:$12 sps:$4 sm:$0xff]  }
  0x88   :  { %2240 = vmatpush3.bf16.msra.mxu1 %v2464_v28  ;;  %1188 = vmatprep.subr.bf16.mxu0 %v2468_v30  ;;  %v2758_v28 = vmov 0.0   ;;  %v2532_v30 = vld [vmem:[#allocation5 + $0x410] ss:$12 sps:$4 sm:$0xff]  }
  0x89   :  { %2241 = vmatprep.subr.bf16.mxu1 %v2465_v29  ;;  %v2531_v29 = vld [vmem:[#allocation5 + $0x368] ss:$12 sps:$4 sm:$0xff]  }
  0x8b   :  { %1189 = vmatpush1.bf16.msra.mxu0 %v2466_v31  ;;  %v2533_v31 = vld [vmem:[#allocation5 + $0x350] ss:$12 sps:$4 sm:$0xff]  }
  0x8c   :  { %2242 = vmatpush3.bf16.msra.mxu1 %v2469_v32  ;;  %1190 = vmatprep.subr.bf16.mxu0 %v2473_v34  ;;  %v2534_v32 = vld [vmem:[#allocation5 + $0x3f8] ss:$12 sps:$4 sm:$0xff]   ;;  %v2543_v34 = vld [vmem:[#allocation7 + $0x74] ss:$8 sps:$4 sm:$0xff]  }
  0x8d   :  { %2243 = vmatprep.subr.bf16.mxu1 %v2470_v33  ;;  %v2541_v33 = vld [vmem:[#allocation7 + $0x70] ss:$8 sps:$4 sm:$0xff]  }
  0x8f   :  { %1191 = vmatpush1.bf16.msra.mxu0 %v2471_v35  ;;  %v2546_v35 = vld [vmem:[#allocation7 + $0x64] ss:$8 sps:$4 sm:$0xff]  }
  0x90   :  { %2244 = vmatpush3.bf16.msra.mxu1 %v2474_v36  ;;  %1192 = vmatprep.subr.bf16.mxu0 %v2478_v38  ;;  %v2535_v36 = vld [vmem:[#allocation5 + $0x338] ss:$12 sps:$4 sm:$0xff]   ;;  %v2549_v38 = vld [vmem:[#allocation7 + $0x54] ss:$8 sps:$4 sm:$0xff]  }
  0x91   :  { %2245 = vmatprep.subr.bf16.mxu1 %v2475_v37  ;;  %v2536_v37 = vld [vmem:[#allocation5 + $0x3e0] ss:$12 sps:$4 sm:$0xff]  }
  0x93   :  { %1193 = vmatpush1.bf16.msra.mxu0 %v2476_v39  ;;  %v2537_v39 = vld [vmem:[#allocation5 + $0x320] ss:$12 sps:$4 sm:$0xff]  }
  0x94   :  { %2246 = vmatpush3.bf16.msra.mxu1 %v2479_v40  ;;  %1194 = vmatprep.subr.bf16.mxu0 %v2483_v42  ;;  %v2547_v40 = vld [vmem:[#allocation7 + $0x50] ss:$8 sps:$4 sm:$0xff]   ;;  %v2552_v42 = vld [vmem:[#allocation7 + $0x44] ss:$8 sps:$4 sm:$0xff]  }
  0x95   :  { %2247 = vmatprep.subr.bf16.mxu1 %v2480_v41  ;;  %v2538_v41 = vld [vmem:[#allocation5 + $0x3c8] ss:$12 sps:$4 sm:$0xff]  }
  0x97   :  { %1195 = vmatpush2.bf16.msra.mxu0 %v2481_v43  ;;  %v2539_v43 = vld [vmem:[#allocation5 + $0x308] ss:$12 sps:$4 sm:$0xff]  }
  0x98   :  { %2248 = vmatpush3.bf16.msra.mxu1 %v2484_v45  ;;  %1196 = vmatprep.subr.bf16.mxu0 %v2488_v48  ;;  %v2553_v45 = vld [vmem:[#allocation7 + $0x30] ss:$8 sps:$4 sm:$0xff]   ;;  %v2561_v48 = vld [vmem:[#allocation7 + $0x14] ss:$8 sps:$4 sm:$0xff]  }
  0x99   :  { %2249 = vmatprep.subr.bf16.mxu1 %v2485_v46  ;;  %v2558_v46 = vld [vmem:[#allocation7 + $0x24] ss:$8 sps:$4 sm:$0xff]  }
  0x9b   :  { %1197 = vmatpush2.bf16.msra.mxu0 %v2486_v49  ;;  %v2559_v49 = vld [vmem:[#allocation7 + $0x10] ss:$8 sps:$4 sm:$0xff]  }
  0x9c   :  { %2250 = vmatpush3.bf16.msra.mxu1 %v2489_v50  ;;  %1198 = vmatprep.subr.bf16.mxu0 %v2493_v53  ;;  %v2562_v50 = vld [vmem:[#allocation7] ss:$8 sps:$4 sm:$0xff]   ;;  %v2567_v53 = vld [vmem:[#allocation7 + $0xf4] ss:$8 sps:$4 sm:$0xff]  }
  0x9d   :  { %2257 = vmatprep.subr.bf16.mxu1 %v2490_v51  ;;  %v2564_v51 = vld [vmem:[#allocation7 + $0x4] ss:$8 sps:$4 sm:$0xff]  }
  0x9f   :  { %1293 = vmatmul.mubr.bf16.vlgmr.msra.gmra.mxu1 %v2819_v8  ;;  %1199 = vmatpush2.bf16.msra.mxu0 %v2491_v54  ;;  %v2515_v8 = vld [vmem:[#allocation5 + $0x278] ss:$12 sps:$4 sm:$0xff]   ;;  %v2565_v54 = vld [vmem:[#allocation7 + $0xf0] ss:$8 sps:$4 sm:$0xff]  }
  0xa0   :  { %2258 = vmatpush3.bf16.msra.mxu1 %v2494_v55  ;;  %1200 = vmatprep.subr.bf16.mxu0 %v2498_v57  ;;  %v2570_v55 = vld [vmem:[#allocation7 + $0xe4] ss:$8 sps:$4 sm:$0xff]   ;;  %v2573_v57 = vld [vmem:[#allocation7 + $0xd4] ss:$8 sps:$4 sm:$0xff]  }
  0xa1   :  { %2259 = vmatprep.subr.bf16.mxu1 %v2495_v56  ;;  %1332 = vmatprep.mubr.bf16.mxu1 %v2815_v52  ;;  %v2516_v52 = vld [vmem:[#allocation5 + $0x3c0] ss:$12 sps:$4 sm:$0xff]  }
  0xa2   :  { %v2568_v56 = vld [vmem:[#allocation7 + $0xe0] ss:$8 sps:$4 sm:$0xff]  }
  0xa3   :  { %1201 = vmatpush2.bf16.msra.mxu0 %v2496_v58  ;;  %v2576_v58 = vld [vmem:[#allocation7 + $0xc4] ss:$8 sps:$4 sm:$0xff]  }
  0xa4   :  { %2260 = vmatpush3.bf16.msra.mxu1 %v2499_v59  ;;  %1202 = vmatprep.subr.bf16.mxu0 %v2503_v61  ;;  %v2574_v59 = vld [vmem:[#allocation7 + $0xc0] ss:$8 sps:$4 sm:$0xff]   ;;  %v2577_v61 = vld [vmem:[#allocation7 + $0xb0] ss:$8 sps:$4 sm:$0xff]  }
  0xa5   :  { %2261 = vmatprep.subr.bf16.mxu1 %v2500_v60  ;;  %v2579_v60 = vld [vmem:[#allocation7 + $0xb4] ss:$8 sps:$4 sm:$0xff]  }
  0xa7   :  { %1203 = vmatpush2.bf16.msra.mxu0 %v2501_v62  ;;  %v2582_v62 = vld [vmem:[#allocation7 + $0xa4] ss:$8 sps:$4 sm:$0xff]  }
  0xa8   :  { %2262 = vmatpush3.bf16.msra.mxu1 %v2504_v63  ;;  %1204 = vmatprep.subr.bf16.mxu0 %v2508_v1  ;;  %v2580_v63 = vld [vmem:[#allocation7 + $0xa0] ss:$8 sps:$4 sm:$0xff]   ;;  %v2583_v1 = vld [vmem:[#allocation7 + $0x90] ss:$8 sps:$4 sm:$0xff]  }
  0xa9   :  { %2263 = vmatprep.subr.bf16.mxu1 %v2505_v0  ;;  %v2585_v0 = vld [vmem:[#allocation7 + $0x94] ss:$8 sps:$4 sm:$0xff]  }
  0xab   :  { %1205 = vmatpush2.bf16.msra.mxu0 %v2506_v2  ;;  %v2588_v2 = vld [vmem:[#allocation7 + $0x84] ss:$8 sps:$4 sm:$0xff]  }
  0xac   :  { %2264 = vmatpush3.bf16.msra.mxu1 %v2509_v3  ;;  %1206 = vmatprep.subr.bf16.mxu0 %v2513_v5  ;;  %v2586_v3 = vld [vmem:[#allocation7 + $0x80] ss:$8 sps:$4 sm:$0xff]   ;;  %v2591_v5 = vld [vmem:[#allocation7 + $0x174] ss:$8 sps:$4 sm:$0xff]  }
  0xad   :  { %2265 = vmatprep.subr.bf16.mxu1 %v2510_v4  ;;  %v2589_v4 = vld [vmem:[#allocation7 + $0x170] ss:$8 sps:$4 sm:$0xff]  }
  0xaf   :  { %1207 = vmatpush2.bf16.msra.mxu0 %v2511_v6  ;;  %v2594_v6 = vld [vmem:[#allocation7 + $0x164] ss:$8 sps:$4 sm:$0xff]  }
  0xb0   :  { %2266 = vmatpush3.bf16.msra.mxu1 %v2514_v7  ;;  %1208 = vmatprep.subr.bf16.mxu0 %v2518_v10  ;;  %v2592_v7 = vld [vmem:[#allocation7 + $0x160] ss:$8 sps:$4 sm:$0xff]   ;;  %v2595_v10 = vld [vmem:[#allocation7 + $0x150] ss:$8 sps:$4 sm:$0xff]  }
  0xb1   :  { %2267 = vmatprep.subr.bf16.mxu1 %v2515_v8  ;;  %v2597_v8 = vld [vmem:[#allocation7 + $0x154] ss:$8 sps:$4 sm:$0xff]  }
  0xb3   :  { %1209 = vmatpush2.bf16.msra.mxu0 %v2516_v52  ;;  %v2600_v52 = vld [vmem:[#allocation7 + $0x144] ss:$8 sps:$4 sm:$0xff]  }
  0xb4   :  { %2268 = vmatpush3.bf16.msra.mxu1 %v2519_v11  ;;  %2279 = vmatprep.subr.bf16.mxu0 %v2522_v14  ;;  %v2598_v11 = vld [vmem:[#allocation7 + $0x140] ss:$8 sps:$4 sm:$0xff]   ;;  %v2606_v14 = vld [vmem:[#allocation7 + $0x124] ss:$8 sps:$4 sm:$0xff]  }
  0xb5   :  { %2269 = vmatprep.subr.bf16.mxu1 %v2520_v13  ;;  %v2601_v13 = vld [vmem:[#allocation7 + $0x130] ss:$8 sps:$4 sm:$0xff]  }
  0xb6   :  { %1211 = vmatmul.mubr.bf16.vlgmr.msra.gmra.mxu0 %v2836_v18 }
  0xb7   :  { %2280 = vmatpush3.bf16.msra.mxu0 %v2523_v17  ;;  %1372 = vmatprep.mubr.bf16.mxu0 %v2831_v47  ;;  %v2556_v47 = vld [vmem:[#allocation7 + $0x20] ss:$8 sps:$4 sm:$0xff]   ;;  %v2609_v17 = vld [vmem:[#allocation7 + $0x114] ss:$8 sps:$4 sm:$0xff]  }
  0xb8   :  { %2270 = vmatpush3.bf16.msra.mxu1 %v2521_v15  ;;  %2281 = vmatprep.subr.bf16.mxu0 %v2526_v21  ;;  %v2604_v15 = vld [vmem:[#allocation7 + $0x120] ss:$8 sps:$4 sm:$0xff]  }
  0xb9   :  { %2271 = vmatprep.subr.bf16.mxu1 %v2524_v20  ;;  %v2612_v20 = vld [vmem:[#allocation7 + $0x104] ss:$8 sps:$4 sm:$0xff]   ;;  %v2610_v21 = vld [vmem:[#allocation7 + $0x100] ss:$8 sps:$4 sm:$0xff]  }
  0xbb   :  { %2282 = vmatpush3.bf16.msra.mxu0 %v2527_v23 }
  0xbc   :  { %2272 = vmatpush3.bf16.msra.mxu1 %v2525_v22  ;;  %2283 = vmatprep.subr.bf16.mxu0 %v2528_v24 }
  0xbd   :  { %2325 = vmatprep.subr.bf16.mxu1 %v2758_v28 }
  0xbf   :  { %1333 = vmatmul.mubr.bf16.vlgmr.msra.gmra.mxu1 %v2821_v9  ;;  %2284 = vmatpush3.bf16.msra.mxu0 %v2529_v25  ;;  %v2544_v9 = vld [vmem:[#allocation7 + $0x60] ss:$8 sps:$4 sm:$0xff]  }
  0xc0   :  { %2326 = vmatpush3.bf16.msra.mxu1 %v2540_v26  ;;  %2285 = vmatprep.subr.bf16.mxu0 %v2530_v27 }
  0xc1   :  { %2327 = vmatprep.mubr.msk.bf16.mxu1 %vm2759_vm1, %v2758_v28  ;;  %1735 = vmatprep.subr.bf16.mxu1 %v2543_v34 }
  0xc3   :  { %2286 = vmatpush3.bf16.msra.mxu0 %v2531_v29 }
  0xc4   :  { %2287 = vmatprep.subr.bf16.mxu0 %v2532_v30 }
  0xc7   :  { %2328 = vmatmul.mubr.msk.bf16.vlgmr.msra.gmra.mxu1 %vm1092_vm0, %v2826_v19  ;;  %2288 = vmatpush3.bf16.msra.mxu0 %v2533_v31  ;;  %v2550_v19 = vld [vmem:[#allocation7 + $0x40] ss:$8 sps:$4 sm:$0xff]  }
  0xc8   :  { %1736 = vmatpush1.bf16.msra.mxu1 %v2541_v33  ;;  %2289 = vmatprep.subr.bf16.mxu0 %v2534_v32 }
  0xc9   :  { %1737 = vmatprep.subr.bf16.mxu1 %v2546_v35 }
  0xcb   :  { %2290 = vmatpush3.bf16.msra.mxu0 %v2535_v36  ;;  %v293_v36 = vlaneseq }
  0xcc   :  { %1738 = vmatpush1.bf16.msra.mxu1 %v2544_v9  ;;  %2291 = vmatprep.subr.bf16.mxu0 %v2536_v37 }
  0xcd   :  { %1739 = vmatprep.subr.bf16.mxu1 %v2549_v38  ;;  %v2845_v38 = vshrl.u32 %v293_v36, 7  ;;  %v2620_v36 = vld [vmem:[#allocation8 + $0x20] sm:$0xff]  }
  0xcf   :  { %2292 = vmatpush3.bf16.msra.mxu0 %v2537_v39  ;;  %v295_v39 = vsub.s32 0, %v2845_v38 }
  0xd0   :  { %1740 = vmatpush1.bf16.msra.mxu1 %v2547_v40  ;;  %2293 = vmatprep.subr.bf16.mxu0 %v2538_v41  ;;  %v291_v40 = vld [vmem:[%s2872_s2] sm:$0x7]  ;;  %v299_v41 = vsub.s32 1, %v2845_v38 }
  0xd1   :  { %1741 = vmatprep.subr.bf16.mxu1 %v2552_v42  ;;  %v296_v42 = vrot.slane %v291_v40, %v295_v39 }
  0xd3   :  { %2294 = vmatpush3.bf16.msra.mxu0 %v2539_v43  ;;  %v300_v43 = vrot.slane %v291_v40, %v299_v41 }
  0xd4   :  { %1742 = vmatpush1.bf16.msra.mxu1 %v2550_v19  ;;  %1776 = vmatprep.subr.bf16.mxu0 %v2591_v5 }
  0xd5   :  { %1743 = vmatprep.subr.bf16.mxu1 %v2555_v44 }
  0xd6   :  { %1373 = vmatmul.mubr.bf16.vlgmr.msra.gmra.mxu0 %v2836_v18  ;;  %v2607_v18 = vld [vmem:[#allocation7 + $0x110] ss:$8 sps:$4 sm:$0xff]  }
  0xd7   :  { %1808 = vmatprep.mubr.bf16.mxu0 %v2757_v16  ;;  %v2571_v16 = vld [vmem:[#allocation7 + $0xd0] ss:$8 sps:$4 sm:$0xff]   ;;  %1777 = vmatpush1.bf16.msra.mxu0 %v2589_v4 }
  0xd8   :  { %1744 = vmatpush1.bf16.msra.mxu1 %v2553_v45  ;;  %1778 = vmatprep.subr.bf16.mxu0 %v2594_v6  ;;  %v303_v6 = vsub.s32 2, %v2845_v38 }
  0xd9   :  { %1745 = vmatprep.subr.bf16.mxu1 %v2558_v46 }
  0xdb   :  { %1779 = vmatpush1.bf16.msra.mxu0 %v2592_v7 }
  0xdc   :  { %1746 = vmatpush1.bf16.msra.mxu1 %v2556_v47  ;;  %1780 = vmatprep.subr.bf16.mxu0 %v2597_v8 }
  0xdd   :  { %1747 = vmatprep.subr.bf16.mxu1 %v2561_v48 }
  0xdf   :  { %1781 = vmatpush1.bf16.msra.mxu0 %v2595_v10 }
  0xe0   :  { %1748 = vmatpush1.bf16.msra.mxu1 %v2559_v49  ;;  %1782 = vmatprep.subr.bf16.mxu0 %v2600_v52  ;;  %v304_v52 = vrot.slane %v291_v40, %v303_v6  ;;  %v2623_v40 = vld [vmem:[#allocation8 + $0x50] sm:$0xff]  }
  0xe1   :  { %1749 = vmatprep.subr.bf16.mxu1 %v2564_v51 }
  0xe3   :  { %1783 = vmatpush1.bf16.msra.mxu0 %v2598_v11 }
  0xe4   :  { %1750 = vmatpush1.bf16.msra.mxu1 %v2562_v50  ;;  %1784 = vmatprep.subr.bf16.mxu0 %v2603_v12 }
  0xe5   :  { %1751 = vmatprep.subr.bf16.mxu1 %v2567_v53 }
  0xe7   :  { %1785 = vmatpush1.bf16.msra.mxu0 %v2601_v13 }
  0xe8   :  { %1752 = vmatpush2.bf16.msra.mxu1 %v2565_v54  ;;  %1786 = vmatprep.subr.bf16.mxu0 %v2606_v14 }
  0xe9   :  { %1753 = vmatprep.subr.bf16.mxu1 %v2570_v55 }
  0xeb   :  { %1787 = vmatpush1.bf16.msra.mxu0 %v2604_v15 }
  0xec   :  { %1754 = vmatpush2.bf16.msra.mxu1 %v2568_v56  ;;  %1788 = vmatprep.subr.bf16.mxu0 %v2609_v17 }
  0xed   :  { %1755 = vmatprep.subr.bf16.mxu1 %v2573_v57 }
  0xef   :  { %1789 = vmatpush1.bf16.msra.mxu0 %v2607_v18 }
  0xf0   :  { %1756 = vmatpush2.bf16.msra.mxu1 %v2571_v16  ;;  %1790 = vmatprep.subr.bf16.mxu0 %v2612_v20 }
  0xf1   :  { %1757 = vmatprep.subr.bf16.mxu1 %v2576_v58 }
  0xf3   :  { %1791 = vmatpush1.bf16.msra.mxu0 %v2610_v21 }
  0xf4   :  { %1758 = vmatpush2.bf16.msra.mxu1 %v2574_v59 }
  0xf5   :  { %1759 = vmatprep.subr.bf16.mxu1 %v2579_v60 }
  0xf8   :  { %1760 = vmatpush2.bf16.msra.mxu1 %v2577_v61 }
  0xf9   :  { %1761 = vmatprep.subr.bf16.mxu1 %v2582_v62 }
  0xfc   :  { %1762 = vmatpush2.bf16.msra.mxu1 %v2580_v63 }
  0xfd   :  { %1763 = vmatprep.subr.bf16.mxu1 %v2585_v0 }
 0x100   :  { %1764 = vmatpush2.bf16.msra.mxu1 %v2583_v1 }
 0x101   :  { %1765 = vmatprep.subr.bf16.mxu1 %v2588_v2 }
 0x104   :  { %1766 = vmatpush2.bf16.msra.mxu1 %v2586_v3 }
 0x136   :  { %v1130_v22 = vpop.f32.mrf.mxu0 }
 0x137   :  { %v1171_v23 = vpop.f32.mrf.mxu1  ;;  %v1131_v19 = vadd.f32 %v1130_v22, %v296_v42  ;;  %v2624_v42 = vld [vmem:[#allocation8 + $0x10] sm:$0xff]  }
 0x138   :  { %v1132_v24 = vpop.f32.mrf.mxu0 }
 0x139   :  { %v1173_v25 = vpop.f32.mrf.mxu1  ;;  %v1133_v44 = vadd.f32 %v1132_v24, %v300_v43  ;;  %v1172_v45 = vadd.f32 %v1171_v23, %v1131_v19  ;;  %v2625_v43 = vld [vmem:[#allocation8 + $0x48] sm:$0xff]  }
 0x13a   :  { %v1134_v26 = vpop.f32.mrf.mxu0  ;;  %v2626_v19 = vld [vmem:[#allocation8 + $0x8] sm:$0xff]  }
 0x13b   :  { %v1175_v27 = vpop.f32.mrf.mxu1  ;;  %v1174_v47 = vadd.f32 %v1173_v25, %v1133_v44  ;;  %v2627_v44 = vld [vmem:[#allocation8 + $0x40] sm:$0xff]  }
 0x13c   :  { %v1135_v28 = vpop.f32.mrf.mxu0 }
 0x13d   :  { %v1176_v29 = vpop.f32.mrf.mxu1 }
 0x13e   :  { %v2613_v29 = vld [vmem:[#allocation8 + $0x78] sm:$0xff]  }
 0x13f   :  { %v1253_v30 = vpop.f32.mrf.mxu1  ;;  %2303 = vmatprep.subr.bf16.mxu0 %v2613_v29 }
 0x141   :  { %v1255_v31 = vpop.f32.mrf.mxu1 }
 0x143   :  { %v1257_v32 = vpop.f32.mrf.mxu1 }
 0x144   :  { %v2616_v32 = vld [vmem:[#allocation8 + $0x30] sm:$0xff]  }
 0x145   :  { %v1258_v33 = vpop.f32.mrf.mxu1 }
 0x146   :  { %v2617_v33 = vld [vmem:[#allocation8 + $0x68] sm:$0xff]  }
 0x15f   :  { %v2251_v34 = vpop.f32.mrf.mxu1 }
 0x161   :  { %v2252_v35 = vpop.f32.mrf.mxu1 }
 0x162   :  { %v2253_v11 = vadd.f32 %v2252_v35, %v2251_v34  ;;  %v2618_v34 = vld [vmem:[#allocation8 + $0x28] sm:$0xff]   ;;  %v2619_v35 = vld [vmem:[#allocation8 + $0x60] sm:$0xff]  }
 0x163   :  { %v2254_v9 = vpop.f32.mrf.mxu1 }
 0x164   :  { %v1295_v14 = vadd.f32 %v2253_v11, %v304_v52  ;;  %v2621_v9 = vld [vmem:[#allocation8 + $0x58] sm:$0xff]  }
 0x165   :  { %v2255_v37 = vpop.f32.mrf.mxu1 }
 0x166   :  { %v2622_v37 = vld [vmem:[#allocation8 + $0x18] sm:$0xff]  }
 0x176   :  { %v1212_v46 = vpop.f32.mrf.mxu0 }
 0x177   :  { %v1213_v48 = vadd.f32 %v1212_v46, %v1172_v45  ;;  %v2628_v45 = vld [vmem:[#allocation8] sm:$0xff]  }
 0x178   :  { %v1214_v49 = vpop.f32.mrf.mxu0 }
 0x179   :  { %v1254_v50 = vadd.f32 %v1253_v30, %v1213_v48  ;;  %v1215_v51 = vadd.f32 %v1214_v49, %v1174_v47  ;;  %v2614_v30 = vld [vmem:[#allocation8 + $0x38] sm:$0xff]  }
 0x17a   :  { %v1216_v53 = vpop.f32.mrf.mxu0 }
 0x17b   :  { %v1420_v54 = vmul.f32 0.5, %v1254_v50  ;;  %v1256_v55 = vadd.f32 %v1255_v31, %v1215_v51  ;;  %v2615_v31 = vld [vmem:[#allocation8 + $0x70] sm:$0xff]  }
 0x17c   :  { %v1217_v56 = vpop.f32.mrf.mxu0  ;;  %v1483_v50 = vld [vmem:[%s2874_s4] sm:$0x3] }
 0x17d   :  { %2629 = vtanh.f32 %v1420_v54  ;;  %v1421_v57 = vmul.f32 0.5, %v1256_v55  ;;  %v1488_v51 = vrot.slane %v1483_v50, %v295_v39  ;;  %v1492_v53 = vrot.slane %v1483_v50, %v299_v41 }
 0x17f   :  { %v2273_v16 = vpop.f32.mrf.mxu1  ;;  %2631 = vtanh.f32 %v1421_v57 }
 0x181   :  { %v2274_v58 = vpop.f32.mrf.mxu1 }
 0x182   :  { %v2275_v12 = vadd.f32 %v2274_v58, %v2273_v16 }
 0x183   :  { %v2276_v59 = vpop.f32.mrf.mxu1 }
 0x184   :  { %v1335_v17 = vadd.f32 %v2275_v12, %v1295_v14 }
 0x185   :  { %v2277_v60 = vpop.f32.mrf.mxu1 }
 0x187   :  { %v1414_v61 = vpop.f32.mrf.mxu1 }
 0x189   :  { %v2329_v62 = vpop.f32.mrf.mxu1 }
 0x18a   :  { %v2630_v63 = vpop.eup %2629 }
 0x18b   :  { %v1417_v0 = vpop.f32.mrf.mxu1  ;;  %v1426_v1 = vmul.f32 0.5, %v2630_v63 }
 0x18c   :  { %v2632_v2 = vpop.eup %2631 }
 0x18d   :  { %v2330_v3 = vpop.f32.mrf.mxu1  ;;  %v1427_v4 = vmul.f32 0.5, %v2632_v2  ;;  %v1429_v5 = vadd.f32 0.5, %v1426_v1 }
 0x18f   :  { %v1430_v7 = vadd.f32 0.5, %v1427_v4  ;;  %v1432_v10 = vpack.c.bf16 %v1429_v5, %v1429_v5  ;;  %v2218_v5 = vld [vmem:[%s2876_s6] ss:$0 sm:$0xff] }
 0x191   :  { %v1433_v8 = vpack.c.bf16 %v1430_v7, %v1430_v7 }
 0x193   :  { %1767 = vmatprep.mubr.bf16.mxu1 %v1433_v8 }
 0x194   :  { %1768 = vmatmul.mubr.bf16.vlgmr.msra.gmra.mxu1 %v1432_v10 }
 0x196   :  { %v2295_v13 = vpop.f32.mrf.mxu0 }
 0x198   :  { %v2296_v15 = vpop.f32.mrf.mxu0 }
 0x199   :  { %v2297_v18 = vadd.f32 %v2296_v15, %v2295_v13 }
 0x19a   :  { %v2298_v20 = vpop.f32.mrf.mxu0 }
 0x19b   :  { %v1375_v21 = vadd.f32 %v2297_v18, %v1335_v17 }
 0x19c   :  { %v2299_v22 = vpop.f32.mrf.mxu0 }
 0x19d   :  { %v1415_v23 = vadd.f32 %v1414_v61, %v1375_v21 }
 0x19f   :  { %v1422_v24 = vmul.f32 0.5, %v1415_v23 }
 0x1a1   :  { %2633 = vtanh.f32 %v1422_v24 }
 0x1ae   :  { %v2634_v25 = vpop.eup %2633 }
 0x1af   :  { %v1428_v26 = vmul.f32 0.5, %v2634_v25 }
 0x1b1   :  { %v1431_v27 = vadd.f32 0.5, %v1428_v26 }
 0x1b3   :  { %v1434_v28 = vpack.c.bf16 %v1431_v27, %v1431_v27 }
 0x1b5   :  { %1809 = vmatmul.mubr.bf16.vlgmr.msra.gmra.mxu0 %v1434_v28 }
 0x1b6   :  { %2304 = vmatpush3.bf16.msra.mxu0 %v2614_v30 }
 0x1b7   :  { %2305 = vmatprep.subr.bf16.mxu0 %v2615_v31 }
 0x1ba   :  { %2306 = vmatpush3.bf16.msra.mxu0 %v2616_v32 }
 0x1bb   :  { %2307 = vmatprep.subr.bf16.mxu0 %v2617_v33 }
 0x1be   :  { %2308 = vmatpush3.bf16.msra.mxu0 %v2618_v34 }
 0x1bf   :  { %2309 = vmatprep.subr.bf16.mxu0 %v2619_v35 }
 0x1c2   :  { %2310 = vmatpush3.bf16.msra.mxu0 %v2620_v36 }
 0x1c3   :  { %2311 = vmatprep.subr.bf16.mxu0 %v2621_v9 }
 0x1c6   :  { %2312 = vmatpush3.bf16.msra.mxu0 %v2622_v37 }
 0x1c7   :  { %2313 = vmatprep.subr.bf16.mxu0 %v2623_v40 }
 0x1ca   :  { %2314 = vmatpush3.bf16.msra.mxu0 %v2624_v42 }
 0x1cb   :  { %2315 = vmatprep.subr.bf16.mxu0 %v2625_v43 }
 0x1ce   :  { %2316 = vmatpush3.bf16.msra.mxu0 %v2626_v19 }
 0x1cf   :  { %2317 = vmatprep.subr.bf16.mxu0 %v2627_v44 }
 0x1d2   :  { %2318 = vmatpush3.bf16.msra.mxu0 %v2628_v45 }
 0x254   :  { %v1769_v46 = vpop.f32.mrf.mxu1 }
 0x255   :  { %v1770_v54 = vadd.f32 %v1769_v46, %v1488_v51 }
 0x256   :  { %v1771_v47 = vpop.f32.mrf.mxu1 }
 0x257   :  { %v1772_v56 = vadd.f32 %v1771_v47, %v1492_v53 }
 0x258   :  { %v1773_v48 = vpop.f32.mrf.mxu1 }
 0x25a   :  { %v1774_v49 = vpop.f32.mrf.mxu1 }
 0x275   :  { %v1810_v55 = vpop.f32.mrf.mxu0 }
 0x276   :  { %v1811_v57 = vadd.f32 %v1810_v55, %v1770_v54 }
 0x277   :  { %v1812_v16 = vpop.f32.mrf.mxu0 }
 0x278   :  { %v1817_v58 = vmul.f32 0.5, %v1811_v57  ;;  %v1813_v59 = vadd.f32 %v1812_v16, %v1772_v56 }
 0x279   :  { %v1814_v60 = vpop.f32.mrf.mxu0 }
 0x27a   :  { %2635 = vtanh.f32 %v1817_v58  ;;  %v1818_v61 = vmul.f32 0.5, %v1813_v59 }
 0x27b   :  { %v1815_v62 = vpop.f32.mrf.mxu0 }
 0x27c   :  { %2637 = vtanh.f32 %v1818_v61 }
 0x287   :  { %v2636_v63 = vpop.eup %2635 }
 0x288   :  { %v1821_v0 = vmul.f32 0.5, %v2636_v63 }
 0x289   :  { %v2638_v1 = vpop.eup %2637 }
 0x28a   :  { %v1822_v2 = vmul.f32 0.5, %v2638_v1  ;;  %v1823_v39 = vadd.f32 0.5, %v1821_v0 }
 0x28c   :  { %v1824_v3 = vadd.f32 0.5, %v1822_v2  ;;  %v1825_v41 = vpack.c.bf16 %v1823_v39, %v1823_v39 }
 0x28e   :  { %v1826_v38 = vpack.c.bf16 %v1824_v3, %v1824_v3 }
 0x290   :  { %1994 = vmatprep.mubr.bf16.mxu0 %v1826_v38 }
 0x291   :  { %1995 = vmatmul.mubr.bf16.vlgmr.msra.gmra.mxu0 %v1825_v41 }
 0x351   :  { %v2319_v4 = vpop.f32.mrf.mxu0 }
 0x353   :  { %v2320_v6 = vpop.f32.mrf.mxu0 }
 0x354   :  { %v2321_v7 = vadd.f32 %v2320_v6, %v2319_v4 }
 0x355   :  { %v2322_v8 = vpop.f32.mrf.mxu0 }
 0x356   :  { %v1997_v10 = vadd.f32 %v2321_v7, %v2218_v5 }
 0x357   :  { %v2323_v52 = vpop.f32.mrf.mxu0 }
 0x358   :  { %2003 = vst.msk [vmem:[#allocation10] sm:$0xff] %vm2002_vm2, %v1997_v10 }
 0x359   :  { %2730 = shalt.err (!%p2727_p10)
}
 0x35a   :  { %2013 = dma.vmem_to_hbm [thread:$0]  %s2011_s28, 128, %s2877_s7, [#allocation4]  }
 0x35b   :  { %2745 = dma.done.wait [#allocation4], 128  }
 0x35c   :  { %2746 = vsyncadd [#allocation4], 4294967168 }
 0x35d   :  { %2017 = vsyncpa [#allocation3], 1 }
 0x35e   :  { %2018 = vsyncpa [#allocation6], 1 }
 0x35f   :  { %2019 = vsyncpa [#allocation9], 1 }
 0x360   :  { %2020 = vsyncpa [#allocation4], 1 }

</bundles_post_ra>
